<compile_context>
chip_gen: v7x
topology: tpu7x:2x2x1
jax: 0.10.0
libtpu: 0.0.40
codegen_flags: <defaults>
</compile_context>

<pallas_src>
import functools

import jax
import jax.numpy as jnp
from jax.experimental import pallas as pl
from jax.experimental.pallas import tpu as pltpu

EPS = 1e-5  # nn.LayerNorm default


# ------------------------------------------------------------------ helpers --
def _round_up(a, b):
    return (a + b - 1) // b * b


def _vmem_budget():
    """(tile-selection budget, requested scoped-VMEM limit) in bytes."""
    cap = 64 * 1024 * 1024  # conservative default: v7x per-TensorCore VMEM
    try:
        cap = int(pltpu.get_tpu_info().vmem_capacity_bytes)
    except Exception:
        pass
    budget = int(cap * 0.70)   # leave headroom for compiler scratch / semaphores
    limit = int(cap * 0.85)
    return budget, limit


def _choose_tm_fused(n_tokens, hp, dtype_bytes, budget):
    """Token-tile rows for the fused (both weights VMEM-resident) kernel,
    or None when the fused path does not fit the budget."""
    w_bytes = 2 * 2 * hp * hp * dtype_bytes          # 2 weights, double-buffered
    p_bytes = 2 * 2 * 8 * hp * dtype_bytes           # merged param rows
    per_row = 4 * hp * dtype_bytes + 6 * hp * 4      # x/out (2x each) + f32 temps
    avail = budget - w_bytes - p_bytes
    if avail < 16 * per_row:
        return None
    tm = min(avail // per_row, 2048, _round_up(n_tokens, 16))
    if n_tokens >= 512:
        # keep >= 2 token tiles so the "parallel" axis shards across TCs (v7x)
        tm = min(tm, _round_up((n_tokens + 1) // 2, 16))
    return int(max((tm // 16) * 16, 16))


def _choose_sublayer_tiles(n_tokens, hp, dtype_bytes, budget):
    """(tm, kt, n_k) for the per-sublayer fallback path."""
    p_bytes = 2 * 8 * hp * dtype_bytes
    per_row = 4 * hp * dtype_bytes + 5 * hp * 4

    # Whole-weight resident (n_k == 1): no accumulator scratch needed.
    avail = budget - 2 * hp * hp * dtype_bytes - p_bytes
    if avail >= 128 * per_row:
        tm = min(avail // per_row, 2048, _round_up(n_tokens, 16))
        if n_tokens >= 512:
            tm = min(tm, _round_up((n_tokens + 1) // 2, 16))
        return int(max((tm // 16) * 16, 16)), hp, 1

    # K-split: prefer 256-aligned K slices (v6e/v7x MXU), 128-aligned fallback.
    kts = sorted({hp // n for n in range(1, hp // 256 + 1)
                  if hp % n == 0 and (hp // n) % 256 == 0}, reverse=True)
    kts += sorted({hp // n for n in range(1, hp // 128 + 1)
                   if hp % n == 0 and (hp // n) % 128 == 0
                   and (hp // n) % 256 != 0}, reverse=True)
    for kt in kts:
        avail = budget - 3 * kt * hp * dtype_bytes - p_bytes  # Buffered(3) weight
        if avail >= 128 * per_row:
            tm = min(avail // per_row, 2048, _round_up(n_tokens, 16))
            return int(max((tm // 16) * 16, 16)), int(kt), hp // kt

    kt = 128
    avail = max(budget - 3 * kt * hp * dtype_bytes - p_bytes, 16 * per_row)
    tm = max(min(avail // per_row, _round_up(n_tokens, 16)) // 16 * 16, 16)
    return int(tm), kt, hp // kt


# ------------------------------------------------------------------ kernels --
def _layernorm(r, gamma, beta, h_real):
    """LayerNorm over the (zero-padded) hidden axis of f32 `r`.
    Sum / sum-of-squares statistics: padded lanes contribute exactly 0."""
    inv_h = jnp.float32(1.0 / h_real)
    mean = jnp.sum(r, axis=-1, keepdims=True) * inv_h
    var = jnp.sum(r * r, axis=-1, keepdims=True) * inv_h - mean * mean
    var = jnp.maximum(var, 0.0)
    return (r - mean) * jax.lax.rsqrt(var + jnp.float32(EPS)) * gamma + beta


def _fused_encoder_kernel(x_ref, w0_ref, p0_ref, w1_ref, p1_ref, o_ref, *, h_real):
    """Both SublayeResConnections on one token tile; weights VMEM-resident.
    p*_ref rows: 0 = linear bias, 1 = LN gamma, 2 = LN beta (rows 3..7 zero)."""
    x = x_ref[...]
    p0 = p0_ref[...].astype(jnp.float32)
    p1 = p1_ref[...].astype(jnp.float32)

    # Sublayer 0: LayerNorm(x + Dropout(attention(x))), dropout = identity.
    r0 = (x.astype(jnp.float32)
          + jnp.dot(x, w0_ref[...], preferred_element_type=jnp.float32)
          + p0[0:1])
    h1 = _layernorm(r0, p0[1:2], p0[2:3], h_real)

    # Sublayer 1: LayerNorm(h1 + Dropout(feed_forward(h1))).
    r1 = (h1
          + jnp.dot(h1.astype(w1_ref.dtype), w1_ref[...],
                    preferred_element_type=jnp.float32)
          + p1[0:1])
    o_ref[...] = _layernorm(r1, p1[1:2], p1[2:3], h_real).astype(o_ref.dtype)


def _sublayer_whole_kernel(x_ref, w_ref, p_ref, o_ref, *, h_real):
    """One SublayeResConnection; whole weight resident, no accumulator scratch."""
    x = x_ref[...]
    p = p_ref[...].astype(jnp.float32)
    r = (x.astype(jnp.float32)
         + jnp.dot(x, w_ref[...], preferred_element_type=jnp.float32)
         + p[0:1])
    o_ref[...] = _layernorm(r, p[1:2], p[2:3], h_real).astype(o_ref.dtype)


def _sublayer_ksplit_kernel(x_ref, w_ref, p_ref, o_ref, acc_ref, *, h_real, kt, n_k):
    """One SublayeResConnection with a K-split reduction (very large d_model)."""
    k = pl.program_id(1)
    start = pl.multiple_of(k * kt, 128)
    xk = x_ref[:, pl.ds(start, kt)]
    partial = jnp.dot(xk, w_ref[...], preferred_element_type=jnp.float32)

    @pl.when(k == 0)
    def _init():
        # Fold residual + bias into the first partial product (no zero-init pass).
        p = p_ref[...].astype(jnp.float32)
        acc_ref[...] = x_ref[...].astype(jnp.float32) + p[0:1] + partial

    @pl.when(k > 0)
    def _accum():
        acc_ref[...] += partial

    @pl.when(k == n_k - 1)
    def _finalize():
        p = p_ref[...].astype(jnp.float32)
        o_ref[...] = _layernorm(acc_ref[...], p[1:2], p[2:3],
                                h_real).astype(o_ref.dtype)


# ------------------------------------------------------------------ wrappers --
def _sublayer_call(x2, w, p, *, h_real, tm, kt, n_k, vmem_limit):
    """One SublayeResConnection on padded (Np, Hp) operands (fallback path)."""
    np_, hp = x2.shape
    n_i = np_ // tm
    dtype_bytes = jnp.dtype(x2.dtype).itemsize

    if n_k == 1:
        kernel = functools.partial(_sublayer_whole_kernel, h_real=h_real)
        grid = (n_i,)
        in_specs = [
            pl.BlockSpec((tm, hp), lambda i: (i, 0)),
            pl.BlockSpec((hp, hp), lambda i: (0, 0)),
            pl.BlockSpec((8, hp), lambda i: (0, 0)),
        ]
        out_specs = pl.BlockSpec((tm, hp), lambda i: (i, 0))
        scratch = []
        dims = ("parallel",)
        w_bytes = hp * hp * dtype_bytes                       # loaded once
    else:
        kernel = functools.partial(_sublayer_ksplit_kernel, h_real=h_real,
                                   kt=kt, n_k=n_k)
        grid = (n_i, n_k)
        try:
            w_spec = pl.BlockSpec((kt, hp), lambda i, k: (k, 0),
                                  pipeline_mode=pl.Buffered(3))
        except TypeError:  # older BlockSpec without pipeline_mode
            w_spec = pl.BlockSpec((kt, hp), lambda i, k: (k, 0))
        in_specs = [
            pl.BlockSpec((tm, hp), lambda i, k: (i, 0)),
            w_spec,
            pl.BlockSpec((8, hp), lambda i, k: (0, 0)),
        ]
        out_specs = pl.BlockSpec((tm, hp), lambda i, k: (i, 0))
        scratch = [pltpu.VMEM((tm, hp), jnp.float32)]
        dims = ("parallel", "arbitrary")
        w_bytes = n_i * hp * hp * dtype_bytes                 # re-streamed per tile

    return pl.pallas_call(
        kernel,
        out_shape=jax.ShapeDtypeStruct((np_, hp), x2.dtype),
        grid_spec=pltpu.PrefetchScalarGridSpec(
            num_scalar_prefetch=0, grid=grid, in_specs=in_specs,
            out_specs=out_specs, scratch_shapes=scratch),
        compiler_params=pltpu.CompilerParams(
            dimension_semantics=dims, vmem_limit_bytes=vmem_limit),
        cost_estimate=pl.CostEstimate(
            flops=2 * np_ * hp * hp + 12 * np_ * hp,
            transcendentals=np_,
            bytes_accessed=(2 * np_ * hp + 8 * hp) * dtype_bytes + w_bytes,
        ),
    )(x2, w, p)


def encoder_layer(x, w_attn, b_attn, g0, be0, w_ff, b_ff, g1, be1):
    """x: (B, S, H) -> (B, S, H).

    LayerNorm(x + attn(x)) then LayerNorm(. + ff(.)); attn/ff are Linear(H, H)
    stand-ins, dropout in eval mode (identity)."""
    B, S, H = x.shape
    N = B * S
    dtype = x.dtype
    dtype_bytes = jnp.dtype(dtype).itemsize
    Hp = _round_up(max(H, 128), 128)
    budget, vmem_limit = _vmem_budget()

    def pad_w(w):
        w = w.astype(dtype)
        return jnp.pad(w, ((0, Hp - H), (0, Hp - H))) if Hp != H else w

    def pack_params(b, g, be):
        p = jnp.stack([b, g, be], axis=0).astype(dtype)       # (3, H)
        return jnp.pad(p, ((0, 5), (0, Hp - H)))              # (8, Hp)

    w0 = pad_w(w_attn)
    w1 = pad_w(w_ff)
    p0 = pack_params(b_attn, g0, be0)
    p1 = pack_params(b_ff, g1, be1)

    tm_fused = _choose_tm_fused(N, Hp, dtype_bytes, budget)

    if tm_fused is not None:
        # ------- fused path: both sublayers in one pallas_call --------------
        tm = tm_fused
        Np = _round_up(N, tm)
        x2 = x.reshape(N, H)
        if Np != N or Hp != H:
            x2 = jnp.pad(x2, ((0, Np - N), (0, Hp - H)))
        n_i = Np // tm
        out = pl.pallas_call(
            functools.partial(_fused_encoder_kernel, h_real=H),
            out_shape=jax.ShapeDtypeStruct((Np, Hp), dtype),
            grid_spec=pltpu.PrefetchScalarGridSpec(
                num_scalar_prefetch=0,
                grid=(n_i,),
                in_specs=[
                    pl.BlockSpec((tm, Hp), lambda i: (i, 0)),   # x token tile
                    pl.BlockSpec((Hp, Hp), lambda i: (0, 0)),   # W_attn (resident)
                    pl.BlockSpec((8, Hp), lambda i: (0, 0)),    # b0/g0/be0
                    pl.BlockSpec((Hp, Hp), lambda i: (0, 0)),   # W_ff (resident)
                    pl.BlockSpec((8, Hp), lambda i: (0, 0)),    # b1/g1/be1
                ],
                out_specs=pl.BlockSpec((tm, Hp), lambda i: (i, 0)),
            ),
            compiler_params=pltpu.CompilerParams(
                dimension_semantics=("parallel",),
                vmem_limit_bytes=vmem_limit,
            ),
            cost_estimate=pl.CostEstimate(
                flops=4 * Np * Hp * Hp + 24 * Np * Hp,
                transcendentals=2 * Np,
                bytes_accessed=(2 * Np * Hp + 2 * Hp * Hp + 16 * Hp) * dtype_bytes,
            ),
        )(x2, w0, p0, w1, p1)
    else:
        # ------- fallback: two sublayer calls (whole-weight or K-split) -----
        tm, kt, n_k = _choose_sublayer_tiles(N, Hp, dtype_bytes, budget)
        Np = _round_up(N, tm)
        x2 = x.reshape(N, H)
        if Np != N or Hp != H:
            x2 = jnp.pad(x2, ((0, Np - N), (0, Hp - H)))
        h1 = _sublayer_call(x2, w0, p0, h_real=H, tm=tm, kt=kt, n_k=n_k,
                            vmem_limit=vmem_limit)
        out = _sublayer_call(h1, w1, p1, h_real=H, tm=tm, kt=kt, n_k=n_k,
                             vmem_limit=vmem_limit)

    if out.shape != (N, H):
        out = out[:N, :H]
    return out.reshape(B, S, H)


# ---------------------------------------------------------------- reference --
def _layernorm_ref(r, gamma, beta):
    mean = jnp.mean(r, axis=-1, keepdims=True)
    var = jnp.mean((r - mean) ** 2, axis=-1, keepdims=True)
    return (r - mean) / jnp.sqrt(var + EPS) * gamma + beta


def _reference(x, w0, b0, g0, be0, w1, b1, g1, be1):
    h = _layernorm_ref(x + (jnp.einsum("bsh,hk->bsk", x, w0) + b0), g0, be0)
    y = _layernorm_ref(h + (jnp.einsum("bsh,hk->bsk", h, w1) + b1), g1, be1)
    return y


if __name__ == "__main__":
    B, S, H = 2, 8, 32  # batch=2, seq=8, d_model=32

    key = jax.random.PRNGKey(0)
    kx, kw0, kb0, kw1, kb1 = jax.random.split(key, 5)

    x = jax.random.normal(kx, (B, S, H), dtype=jnp.float32)
    # "attention" stand-in: Linear(H, H), deterministic init
    w_attn = jax.random.normal(kw0, (H, H), dtype=jnp.float32) * (1.0 / jnp.sqrt(H))
    b_attn = jax.random.normal(kb0, (H,), dtype=jnp.float32) * 0.01
    # "feed_forward" stand-in: Linear(H, H), deterministic init
    w_ff = jax.random.normal(kw1, (H, H), dtype=jnp.float32) * (1.0 / jnp.sqrt(H))
    b_ff = jax.random.normal(kb1, (H,), dtype=jnp.float32) * 0.01
    # LayerNorm params for the two SublayeResConnection clones (PyTorch defaults)
    g0 = jnp.ones((H,), dtype=jnp.float32)
    be0 = jnp.zeros((H,), dtype=jnp.float32)
    g1 = jnp.ones((H,), dtype=jnp.float32)
    be1 = jnp.zeros((H,), dtype=jnp.float32)

    y = encoder_layer(x, w_attn, b_attn, g0, be0, w_ff, b_ff, g1, be1)
    y = jax.block_until_ready(y)

    y_ref = _reference(x, w_attn, b_attn, g0, be0, w_ff, b_ff, g1, be1)
    assert y.shape == (B, S, H)
    assert jnp.allclose(y, y_ref, atol=2e-4, rtol=2e-4), float(
        jnp.max(jnp.abs(y - y_ref)))

    print("KERNEL_OK")
</pallas_src>

<mosaic_0001>
module attributes {stable_mosaic.version = 11 : i64} {
  func.func @_fused_encoder_kernel(%arg0: i32, %arg1: memref<16x128xf32, #tpu.memory_space<vmem>>, %arg2: memref<128x128xf32, #tpu.memory_space<vmem>>, %arg3: memref<8x128xf32, #tpu.memory_space<vmem>>, %arg4: memref<128x128xf32, #tpu.memory_space<vmem>>, %arg5: memref<8x128xf32, #tpu.memory_space<vmem>>, %arg6: memref<16x128xf32, #tpu.memory_space<vmem>>) attributes {dimension_semantics = [#tpu.dimension_semantics<parallel>], iteration_bounds = array<i64: 1>, scalar_prefetch = 0 : i64, scratch_operands = 0 : i64, tpu.core_type = #tpu.core_type<tc>, window_params = [{transform_indices = @transform_0, window_bounds = array<i64: 16, 128>}, {pipeline_mode = #tpu.pipeline_mode<synchronous>, transform_indices = @transform_1, window_bounds = array<i64: 128, 128>}, {pipeline_mode = #tpu.pipeline_mode<synchronous>, transform_indices = @transform_2, window_bounds = array<i64: 8, 128>}, {pipeline_mode = #tpu.pipeline_mode<synchronous>, transform_indices = @transform_3, window_bounds = array<i64: 128, 128>}, {pipeline_mode = #tpu.pipeline_mode<synchronous>, transform_indices = @transform_4, window_bounds = array<i64: 8, 128>}, {transform_indices = @transform_5, window_bounds = array<i64: 16, 128>}]} {
    %c0 = arith.constant 0 : index
    %c0_0 = arith.constant 0 : index
    %0 = vector.load %arg1[%c0, %c0_0] : memref<16x128xf32, #tpu.memory_space<vmem>>, vector<16x128xf32>
    %c0_1 = arith.constant 0 : index
    %c0_2 = arith.constant 0 : index
    %1 = vector.load %arg3[%c0_1, %c0_2] : memref<8x128xf32, #tpu.memory_space<vmem>>, vector<8x128xf32>
    %c0_3 = arith.constant 0 : index
    %c0_4 = arith.constant 0 : index
    %2 = vector.load %arg5[%c0_3, %c0_4] : memref<8x128xf32, #tpu.memory_space<vmem>>, vector<8x128xf32>
    %c0_5 = arith.constant 0 : index
    %c0_6 = arith.constant 0 : index
    %3 = vector.load %arg2[%c0_5, %c0_6] : memref<128x128xf32, #tpu.memory_space<vmem>>, vector<128x128xf32>
    %cst = arith.constant dense<0.000000e+00> : vector<16x128xf32>
    %4 = tpu.matmul %0, %3, %cst {dimension_numbers = #tpu.dot_dimension_numbers<[1], [0], [0], [1], [0, 0, 1, 1], [], []>} : vector<16x128xf32>, vector<128x128xf32>, vector<16x128xf32> -> vector<16x128xf32>
    %5 = arith.addf %0, %4 : vector<16x128xf32>
    %6 = vector.extract_strided_slice %1 {offsets = [0, 0], sizes = [1, 128], strides = [1, 1]} : vector<8x128xf32> to vector<1x128xf32>
    %7 = vector.broadcast %6 : vector<1x128xf32> to vector<16x128xf32>
    %8 = arith.addf %5, %7 : vector<16x128xf32>
    %9 = vector.extract_strided_slice %1 {offsets = [1, 0], sizes = [1, 128], strides = [1, 1]} : vector<8x128xf32> to vector<1x128xf32>
    %10 = vector.extract_strided_slice %1 {offsets = [2, 0], sizes = [1, 128], strides = [1, 1]} : vector<8x128xf32> to vector<1x128xf32>
    %cst_7 = arith.constant dense<0.000000e+00> : vector<16xf32>
    %11 = vector.multi_reduction <add>, %8, %cst_7 [1] : vector<16x128xf32> to vector<16xf32>
    %12 = vector.shape_cast %11 : vector<16xf32> to vector<16x1xf32>
    %cst_8 = arith.constant 3.125000e-02 : f32
    %13 = vector.broadcast %cst_8 : f32 to vector<16x1xf32>
    %14 = arith.mulf %12, %13 : vector<16x1xf32>
    %15 = arith.mulf %8, %8 : vector<16x128xf32>
    %cst_9 = arith.constant dense<0.000000e+00> : vector<16xf32>
    %16 = vector.multi_reduction <add>, %15, %cst_9 [1] : vector<16x128xf32> to vector<16xf32>
    %17 = vector.shape_cast %16 : vector<16xf32> to vector<16x1xf32>
    %cst_10 = arith.constant 3.125000e-02 : f32
    %18 = vector.broadcast %cst_10 : f32 to vector<16x1xf32>
    %19 = arith.mulf %17, %18 : vector<16x1xf32>
    %20 = arith.mulf %14, %14 : vector<16x1xf32>
    %21 = arith.subf %19, %20 : vector<16x1xf32>
    %cst_11 = arith.constant 0.000000e+00 : f32
    %22 = vector.broadcast %cst_11 : f32 to vector<16x1xf32>
    %23 = arith.maximumf %21, %22 : vector<16x1xf32>
    %24 = vector.broadcast %14 : vector<16x1xf32> to vector<16x128xf32>
    %25 = arith.subf %8, %24 : vector<16x128xf32>
    %cst_12 = arith.constant 9.99999974E-6 : f32
    %26 = vector.broadcast %cst_12 : f32 to vector<16x1xf32>
    %27 = arith.addf %23, %26 : vector<16x1xf32>
    %28 = math.rsqrt %27 : vector<16x1xf32>
    %29 = vector.broadcast %28 : vector<16x1xf32> to vector<16x128xf32>
    %30 = arith.mulf %25, %29 : vector<16x128xf32>
    %31 = vector.broadcast %9 : vector<1x128xf32> to vector<16x128xf32>
    %32 = arith.mulf %30, %31 : vector<16x128xf32>
    %33 = vector.broadcast %10 : vector<1x128xf32> to vector<16x128xf32>
    %34 = arith.addf %32, %33 : vector<16x128xf32>
    %c0_13 = arith.constant 0 : index
    %c0_14 = arith.constant 0 : index
    %35 = vector.load %arg4[%c0_13, %c0_14] : memref<128x128xf32, #tpu.memory_space<vmem>>, vector<128x128xf32>
    %cst_15 = arith.constant dense<0.000000e+00> : vector<16x128xf32>
    %36 = tpu.matmul %34, %35, %cst_15 {dimension_numbers = #tpu.dot_dimension_numbers<[1], [0], [0], [1], [0, 0, 1, 1], [], []>} : vector<16x128xf32>, vector<128x128xf32>, vector<16x128xf32> -> vector<16x128xf32>
    %37 = arith.addf %34, %36 : vector<16x128xf32>
    %38 = vector.extract_strided_slice %2 {offsets = [0, 0], sizes = [1, 128], strides = [1, 1]} : vector<8x128xf32> to vector<1x128xf32>
    %39 = vector.broadcast %38 : vector<1x128xf32> to vector<16x128xf32>
    %40 = arith.addf %37, %39 : vector<16x128xf32>
    %41 = vector.extract_strided_slice %2 {offsets = [1, 0], sizes = [1, 128], strides = [1, 1]} : vector<8x128xf32> to vector<1x128xf32>
    %42 = vector.extract_strided_slice %2 {offsets = [2, 0], sizes = [1, 128], strides = [1, 1]} : vector<8x128xf32> to vector<1x128xf32>
    %cst_16 = arith.constant dense<0.000000e+00> : vector<16xf32>
    %43 = vector.multi_reduction <add>, %40, %cst_16 [1] : vector<16x128xf32> to vector<16xf32>
    %44 = vector.shape_cast %43 : vector<16xf32> to vector<16x1xf32>
    %cst_17 = arith.constant 3.125000e-02 : f32
    %45 = vector.broadcast %cst_17 : f32 to vector<16x1xf32>
    %46 = arith.mulf %44, %45 : vector<16x1xf32>
    %47 = arith.mulf %40, %40 : vector<16x128xf32>
    %cst_18 = arith.constant dense<0.000000e+00> : vector<16xf32>
    %48 = vector.multi_reduction <add>, %47, %cst_18 [1] : vector<16x128xf32> to vector<16xf32>
    %49 = vector.shape_cast %48 : vector<16xf32> to vector<16x1xf32>
    %cst_19 = arith.constant 3.125000e-02 : f32
    %50 = vector.broadcast %cst_19 : f32 to vector<16x1xf32>
    %51 = arith.mulf %49, %50 : vector<16x1xf32>
    %52 = arith.mulf %46, %46 : vector<16x1xf32>
    %53 = arith.subf %51, %52 : vector<16x1xf32>
    %cst_20 = arith.constant 0.000000e+00 : f32
    %54 = vector.broadcast %cst_20 : f32 to vector<16x1xf32>
    %55 = arith.maximumf %53, %54 : vector<16x1xf32>
    %56 = vector.broadcast %46 : vector<16x1xf32> to vector<16x128xf32>
    %57 = arith.subf %40, %56 : vector<16x128xf32>
    %cst_21 = arith.constant 9.99999974E-6 : f32
    %58 = vector.broadcast %cst_21 : f32 to vector<16x1xf32>
    %59 = arith.addf %55, %58 : vector<16x1xf32>
    %60 = math.rsqrt %59 : vector<16x1xf32>
    %61 = vector.broadcast %60 : vector<16x1xf32> to vector<16x128xf32>
    %62 = arith.mulf %57, %61 : vector<16x128xf32>
    %63 = vector.broadcast %41 : vector<1x128xf32> to vector<16x128xf32>
    %64 = arith.mulf %62, %63 : vector<16x128xf32>
    %65 = vector.broadcast %42 : vector<1x128xf32> to vector<16x128xf32>
    %66 = arith.addf %64, %65 : vector<16x128xf32>
    %c0_22 = arith.constant 0 : index
    %c0_23 = arith.constant 0 : index
    %67 = vector.load %arg6[%c0_22, %c0_23] : memref<16x128xf32, #tpu.memory_space<vmem>>, vector<16x128xf32>
    tpu.vector_store %arg6[%c0_22, %c0_23], %66 {strides = array<i32>} : memref<16x128xf32, #tpu.memory_space<vmem>>, vector<16x128xf32>,
    return
  }
  func.func @transform_0(%arg0: i32) -> (i32, i32) {
    %c0_i32 = arith.constant 0 : i32
    %c0_i32_0 = arith.constant 0 : i32
    return %arg0, %c0_i32 : i32, i32
  }
  func.func @transform_1(%arg0: i32) -> (i32, i32) {
    %c0_i32 = arith.constant 0 : i32
    %c0_i32_0 = arith.constant 0 : i32
    %c0_i32_1 = arith.constant 0 : i32
    return %c0_i32, %c0_i32_0 : i32, i32
  }
  func.func @transform_2(%arg0: i32) -> (i32, i32) {
    %c0_i32 = arith.constant 0 : i32
    %c0_i32_0 = arith.constant 0 : i32
    %c0_i32_1 = arith.constant 0 : i32
    return %c0_i32, %c0_i32_0 : i32, i32
  }
  func.func @transform_3(%arg0: i32) -> (i32, i32) {
    %c0_i32 = arith.constant 0 : i32
    %c0_i32_0 = arith.constant 0 : i32
    %c0_i32_1 = arith.constant 0 : i32
    return %c0_i32, %c0_i32_0 : i32, i32
  }
  func.func @transform_4(%arg0: i32) -> (i32, i32) {
    %c0_i32 = arith.constant 0 : i32
    %c0_i32_0 = arith.constant 0 : i32
    %c0_i32_1 = arith.constant 0 : i32
    return %c0_i32, %c0_i32_0 : i32, i32
  }
  func.func @transform_5(%arg0: i32) -> (i32, i32) {
    %c0_i32 = arith.constant 0 : i32
    %c0_i32_0 = arith.constant 0 : i32
    return %arg0, %c0_i32 : i32, i32
  }
}

</mosaic_0001>

<bundles_post_ra>
// kernel: tpu_custom_call.1
= control target key start
LH: loop header
LB: loop body
LE: loop exit
PB: predicated region body
PF: predicated region fallthrough
CT: control target
= control target key end

     0   :  { %10 = vsyncpa [#allocation3], 0  ;;  %s832_s0 = inlined_call_operand.hbm [shape: f32[16,128], index: 0, kind: input, shape index: {}]   ;;  %s833_s1 = inlined_call_operand.hbm [shape: f32[128,128], index: 1, kind: input, shape index: {}]   ;;  %s834_s2 = inlined_call_operand.hbm [shape: f32[8,128], index: 2, kind: input, shape index: {}]   ;;  %s835_s3 = inlined_call_operand.hbm [shape: f32[128,128], index: 3, kind: input, shape index: {}]   ;;  %s836_s4 = inlined_call_operand.vmem [shape: f32[8,128], index: 4, kind: input, shape index: {}]   ;;  %s837_s5 = inlined_call_operand.hbm [shape: f32[16,128], index: 5, kind: output, shape index: {}]  }
   0x1   :  { %11 = vsyncpa [#allocation6], 0 }
   0x2   :  { %12 = vsyncpa [#allocation9], 0 }
   0x3   :  { %13 = vsyncpa [#allocation4], 0  ;;  %s680_s18 = smov [#allocation5]   ;;  %s681_s20 = smov [#allocation2]  }
   0x4   :  { %s31_s19 = sshll.u32 %s680_s18, 4  ;;  %s19_s21 = sshll.u32 %s681_s20, 4  ;;  %s32_s19 = int_to_ptr.vmem [resolvable:$true] %s31_s19  ;;  %s717_s21 = int_to_ptr.vmem [resolvable:$true] %s19_s21 }
   0x5   :  { %s562_s24 = scalar_lea.hbm %s833_s1, 2048 }
   0x6   :  { %p563_p0 = scmp.ne.s32.totalorder %s833_s1, %s562_s24  ;;  %p566_p1 = scmp.lt.u32.totalorder %s562_s24, %s833_s1 }
   0x8   :  { %p568_p2 = pnand %p566_p1, %p563_p0 }
   0xa   :  { %571 = shalt.err (!%p568_p2)
}
   0xb   :  { %s572_s29 = scalar_lea.vmem %s32_s19, 2048  ;;  %p577_p4 = scmp.lt.s32.totalorder %s32_s19, %s32_s19 }
   0xc   :  { %p573_p3 = scmp.ne.s32.totalorder %s32_s19, %s572_s29  ;;  %p578_p5 = scmp.lt.s32.totalorder %s572_s29, %s572_s29 }
   0xe   :  { %p579_p6 = por %p578_p5, %p577_p4 }
  0x10   :  { %p580_p7 = pnand %p579_p6, %p573_p3 }
  0x12   :  { %583 = shalt.err (!%p580_p7)
}
  0x13   :  { %s682_s30 = smov 128   ;;  %s683_s6 = smov 8  }
  0x14   :  { %37 = dma.hbm_to_vmem [thread:$0]  %s833_s1, 2048, %s32_s19, [#allocation6], %s682_s30, %s682_s30, %s683_s6  }
  0x15   :  { %s584_s11 = scalar_lea.hbm %s832_s0, 256 }
  0x16   :  { %p585_p8 = scmp.ne.s32.totalorder %s832_s0, %s584_s11  ;;  %p588_p9 = scmp.lt.u32.totalorder %s584_s11, %s832_s0 }
  0x18   :  { %p590_p10 = pnand %p588_p9, %p585_p8 }
  0x1a   :  { %593 = shalt.err (!%p590_p10)
}
  0x1b   :  { %s594_s16 = scalar_lea.vmem %s717_s21, 256  ;;  %p599_p12 = scmp.lt.s32.totalorder %s717_s21, %s717_s21 }
  0x1c   :  { %p595_p11 = scmp.ne.s32.totalorder %s717_s21, %s594_s16  ;;  %p600_p13 = scmp.lt.s32.totalorder %s594_s16, %s594_s16 }
  0x1e   :  { %p601_p0 = por %p600_p13, %p599_p12 }
  0x20   :  { %p602_p1 = pnand %p601_p0, %p595_p11 }
  0x22   :  { %605 = shalt.err (!%p602_p1)
}
  0x23   :  { %25 = dma.hbm_to_vmem [thread:$0]  %s832_s0, 256, %s717_s21, [#allocation3], %s682_s30, %s682_s30, %s683_s6  }
  0x24   :  { %s684_s18 = smov [#allocation7]   ;;  %s685_s20 = smov [#allocation8]  }
  0x25   :  { %s44_s19 = sshll.u32 %s684_s18, 4  ;;  %s53_s22 = sshll.u32 %s685_s20, 4  ;;  %s45_s19 = int_to_ptr.vmem [resolvable:$true] %s44_s19  ;;  %s754_s22 = int_to_ptr.vmem [resolvable:$true] %s53_s22 }
  0x26   :  { %s606_s25 = scalar_lea.hbm %s834_s2, 128 }
  0x27   :  { %p607_p2 = scmp.ne.s32.totalorder %s834_s2, %s606_s25  ;;  %p610_p3 = scmp.lt.u32.totalorder %s606_s25, %s834_s2 }
  0x29   :  { %p612_p4 = pnand %p610_p3, %p607_p2 }
  0x2b   :  { %615 = shalt.err (!%p612_p4)
}
  0x2c   :  { %s616_s0 = scalar_lea.vmem %s45_s19, 128  ;;  %p621_p6 = scmp.lt.s32.totalorder %s45_s19, %s45_s19 }
  0x2d   :  { %p617_p5 = scmp.ne.s32.totalorder %s45_s19, %s616_s0  ;;  %p622_p7 = scmp.lt.s32.totalorder %s616_s0, %s616_s0 }
  0x2f   :  { %p623_p8 = por %p622_p7, %p621_p6 }
  0x31   :  { %p624_p9 = pnand %p623_p8, %p617_p5 }
  0x33   :  { %627 = shalt.err (!%p624_p9)
}
  0x34   :  { %47 = dma.hbm_to_vmem [thread:$0]  %s834_s2, 128, %s45_s19, [#allocation6]  }
  0x35   :  { %s628_s10 = scalar_lea.hbm %s835_s3, 2048 }
  0x36   :  { %p629_p10 = scmp.ne.s32.totalorder %s835_s3, %s628_s10  ;;  %p632_p11 = scmp.lt.u32.totalorder %s628_s10, %s835_s3 }
  0x38   :  { %p634_p12 = pnand %p632_p11, %p629_p10 }
  0x3a   :  { %637 = shalt.err (!%p634_p12)
}
  0x3b   :  { %s638_s15 = scalar_lea.vmem %s754_s22, 2048  ;;  %p643_p0 = scmp.lt.s32.totalorder %s754_s22, %s754_s22 }
  0x3c   :  { %p639_p13 = scmp.ne.s32.totalorder %s754_s22, %s638_s15  ;;  %p644_p1 = scmp.lt.s32.totalorder %s638_s15, %s638_s15 }
  0x3e   :  { %p645_p2 = por %p644_p1, %p643_p0 }
  0x40   :  { %p646_p3 = pnand %p645_p2, %p639_p13 }
  0x42   :  { %649 = shalt.err (!%p646_p3)
}
  0x43   :  { %59 = dma.hbm_to_vmem [thread:$0]  %s835_s3, 2048, %s754_s22, [#allocation9], %s682_s30, %s682_s30, %s683_s6  }
  0x44   :  { %672 = dma.done.wait [#allocation3], 256  }
  0x45   :  { %673 = vsyncadd [#allocation3], 4294967040 }
  0x46   :  { %674 = dma.done.wait [#allocation6], 2176  }
  0x47   :  { %675 = vsyncadd [#allocation6], 4294965120 }
  0x48   :  { %676 = dma.done.wait [#allocation9], 2048  }
  0x49   :  { %677 = vsyncadd [#allocation9], 4294965248  ;;  %v78_v0 = vld [vmem:[#allocation5] sm:$0xff]  ;;  %v79_v1 = vld [vmem:[#allocation5 + $0x8] sm:$0xff]  ;;  %v171_v29 = vlaneseq }
  0x4a   :  { %v80_v2 = vld [vmem:[#allocation5 + $0x10] sm:$0xff]  ;;  %v483_v3 = vpack.c.bf16 %v79_v1, %v78_v0  ;;  %v81_v4 = vld [vmem:[#allocation5 + $0x18] sm:$0xff]  ;;  %v82_v6 = vld [vmem:[#allocation5 + $0x20] sm:$0xff] }
  0x4b   :  { %v487_v5 = vpack.c.bf16 %v81_v4, %v80_v2  ;;  %v83_v7 = vld [vmem:[#allocation5 + $0x28] sm:$0xff]  ;;  %v74_v9 = vld [vmem:[#allocation2] sm:$0xff]  ;;  %v85_v11 = vld [vmem:[#allocation5 + $0x38] sm:$0xff]  ;;  %v788_v30 = vshrl.u32 %v171_v29, 7 }
  0x4c   :  { %484 = vmatprep.subr.bf16.mxu0 %v483_v3  ;;  %v491_v8 = vpack.c.bf16 %v83_v7, %v82_v6  ;;  %v84_v10 = vld [vmem:[#allocation5 + $0x30] sm:$0xff]  ;;  %445 = vmatprep.mubr.f32.mxu0 %v74_v9  ;;  %v86_v13 = vld [vmem:[#allocation5 + $0x40] sm:$0xff]  ;;  %v87_v14 = vld [vmem:[#allocation5 + $0x48] sm:$0xff] }
  0x4d   :  { %486 = vmatpush3.bf16.msra.mxu0 %v483_v3  ;;  %v495_v12 = vpack.c.bf16 %v85_v11, %v84_v10  ;;  %v499_v15 = vpack.c.bf16 %v87_v14, %v86_v13  ;;  %v88_v16 = vld [vmem:[#allocation5 + $0x50] sm:$0xff]  ;;  %v89_v17 = vld [vmem:[#allocation5 + $0x58] sm:$0xff]  ;;  %v90_v19 = vld [vmem:[#allocation5 + $0x60] sm:$0xff]  ;;  %v173_v31 = vsub.s32 0, %v788_v30 }
  0x4e   :  { %488 = vmatprep.subr.bf16.mxu0 %v487_v5  ;;  %v503_v18 = vpack.c.bf16 %v89_v17, %v88_v16  ;;  %v91_v20 = vld [vmem:[#allocation5 + $0x68] sm:$0xff]  ;;  %v92_v22 = vld [vmem:[#allocation5 + $0x70] sm:$0xff]  ;;  %v93_v23 = vld [vmem:[#allocation5 + $0x78] sm:$0xff]  ;;  %v213_v16 = vsub.s32 2, %v788_v30 }
  0x4f   :  { %v507_v21 = vpack.c.bf16 %v91_v20, %v90_v19  ;;  %v511_v24 = vpack.c.bf16 %v93_v23, %v92_v22  ;;  %v75_v25 = vld [vmem:[#allocation2 + $0x8] sm:$0xff]  ;;  %v217_v26 = vld [vmem:[#allocation8] sm:$0xff]  ;;  %v218_v27 = vld [vmem:[#allocation8 + $0x8] sm:$0xff] }
  0x50   :  { %v515_v28 = vpack.c.bf16 %v218_v27, %v217_v26  ;;  %v791_v32 = vld [vmem:[#allocation7] sm:$0xff]  ;;  %v219_v42 = vld [vmem:[#allocation8 + $0x10] sm:$0xff]  ;;  %v221_v45 = vld [vmem:[#allocation8 + $0x20] sm:$0xff] }
  0x51   :  { %490 = vmatpush3.bf16.msra.mxu0 %v487_v5  ;;  %v174_v34 = vrot.slane %v791_v32, %v173_v31  ;;  %v220_v43 = vld [vmem:[#allocation8 + $0x18] sm:$0xff]  ;;  %v222_v46 = vld [vmem:[#allocation8 + $0x28] sm:$0xff]  ;;  %v223_v48 = vld [vmem:[#allocation8 + $0x30] sm:$0xff] }
  0x52   :  { %492 = vmatprep.subr.bf16.mxu0 %v491_v8  ;;  %516 = vmatprep.subr.bf16.mxu1 %v515_v28  ;;  %v519_v44 = vpack.c.bf16 %v220_v43, %v219_v42  ;;  %v523_v47 = vpack.c.bf16 %v222_v46, %v221_v45  ;;  %v224_v49 = vld [vmem:[#allocation8 + $0x38] sm:$0xff]  ;;  %v225_v51 = vld [vmem:[#allocation8 + $0x40] sm:$0xff]  ;;  %v226_v52 = vld [vmem:[#allocation8 + $0x48] sm:$0xff] }
  0x53   :  { %518 = vmatpush3.bf16.msra.mxu1 %v515_v28  ;;  %v527_v50 = vpack.c.bf16 %v224_v49, %v223_v48  ;;  %v531_v53 = vpack.c.bf16 %v226_v52, %v225_v51  ;;  %v227_v54 = vld [vmem:[#allocation8 + $0x50] sm:$0xff]  ;;  %v228_v55 = vld [vmem:[#allocation8 + $0x58] sm:$0xff]  ;;  %v229_v56 = vld [vmem:[#allocation8 + $0x60] sm:$0xff] }
  0x54   :  { %520 = vmatprep.subr.bf16.mxu1 %v519_v44  ;;  %v535_v57 = vpack.c.bf16 %v228_v55, %v227_v54  ;;  %v230_v58 = vld [vmem:[#allocation8 + $0x68] sm:$0xff]  ;;  %v231_v60 = vld [vmem:[#allocation8 + $0x70] sm:$0xff]  ;;  %v232_v61 = vld [vmem:[#allocation8 + $0x78] sm:$0xff] }
  0x55   :  { %494 = vmatpush3.bf16.msra.mxu0 %v491_v8  ;;  %v539_v59 = vpack.c.bf16 %v230_v58, %v229_v56  ;;  %v543_v62 = vpack.c.bf16 %v232_v61, %v231_v60  ;;  %v77_v29 = vld [vmem:[%s836_s4] sm:$0xff]  ;;  %s686_s4 = smov [#allocation10]  }
  0x56   :  { %496 = vmatprep.subr.bf16.mxu0 %v495_v12  ;;  %v353_v61 = vrot.slane %v77_v29, %v213_v16  ;;  %s363_s17 = sshll.u32 %s686_s4, 4  ;;  %s364_s17 = int_to_ptr.vmem [resolvable:$true] %s363_s17 }
  0x57   :  { %522 = vmatpush3.bf16.msra.mxu1 %v519_v44  ;;  %s650_s18 = scalar_lea.vmem %s364_s17, 256  ;;  %p655_p5 = scmp.lt.s32.totalorder %s364_s17, %s364_s17 }
  0x58   :  { %524 = vmatprep.subr.bf16.mxu1 %v523_v47  ;;  %p651_p4 = scmp.ne.s32.totalorder %s364_s17, %s650_s18  ;;  %p656_p6 = scmp.lt.s32.totalorder %s650_s18, %s650_s18 }
  0x59   :  { %498 = vmatpush3.bf16.msra.mxu0 %v495_v12 }
  0x5a   :  { %500 = vmatprep.subr.bf16.mxu0 %v499_v15  ;;  %p657_p7 = por %p656_p6, %p655_p5 }
  0x5b   :  { %526 = vmatpush3.bf16.msra.mxu1 %v523_v47 }
  0x5c   :  { %528 = vmatprep.subr.bf16.mxu1 %v527_v50  ;;  %p658_p8 = pnand %p657_p7, %p651_p4 }
  0x5d   :  { %502 = vmatpush3.bf16.msra.mxu0 %v499_v15  ;;  %v207_v15 = vsub.s32 1, %v788_v30 }
  0x5e   :  { %504 = vmatprep.subr.bf16.mxu0 %v503_v18 }
  0x5f   :  { %530 = vmatpush3.bf16.msra.mxu1 %v527_v50  ;;  %v347_v55 = vrot.slane %v77_v29, %v207_v15 }
  0x60   :  { %532 = vmatprep.subr.bf16.mxu1 %v531_v53 }
  0x61   :  { %506 = vmatpush3.bf16.msra.mxu0 %v503_v18  ;;  %v208_v18 = vrot.slane %v791_v32, %v207_v15 }
  0x62   :  { %508 = vmatprep.subr.bf16.mxu0 %v507_v21 }
  0x63   :  { %534 = vmatpush3.bf16.msra.mxu1 %v531_v53 }
  0x64   :  { %536 = vmatprep.subr.bf16.mxu1 %v535_v57 }
  0x65   :  { %510 = vmatpush3.bf16.msra.mxu0 %v507_v21  ;;  %v214_v21 = vrot.slane %v791_v32, %v213_v16 }
  0x66   :  { %512 = vmatprep.subr.bf16.mxu0 %v511_v24 }
  0x67   :  { %538 = vmatpush3.bf16.msra.mxu1 %v535_v57 }
  0x68   :  { %540 = vmatprep.subr.bf16.mxu1 %v539_v59 }
  0x69   :  { %514 = vmatpush3.bf16.msra.mxu0 %v511_v24 }
  0x6b   :  { %542 = vmatpush3.bf16.msra.mxu1 %v539_v59 }
  0x6c   :  { %446 = vmatmul.mubr.f32.vlgmr.msra.gmra.mrb[0].mxu0 %v75_v25  ;;  %544 = vmatprep.subr.bf16.mxu1 %v543_v62 }
  0x6f   :  { %546 = vmatpush3.bf16.msra.mxu1 %v543_v62 }
 0x13f   :  { %v447_v33 = vpop.f32.mrb[0].mxu0 }
 0x140   :  { %v160_v35 = vpop.f32.mrb[1].mxu0  ;;  %v170_v36 = vadd.f32 %v447_v33, %v75_v25  ;;  %v313_v33 = vrot.slane %v77_v29, %v173_v31 }
 0x141   :  { %v169_v37 = vadd.f32 %v160_v35, %v74_v9 }
 0x142   :  { %v798_v39 = vadd.f32 %v174_v34, %v170_v36 }
 0x143   :  { %v796_v38 = vadd.f32 %v174_v34, %v169_v37 }
 0x144   :  { %v184_v41 = vmul.f32 %v798_v39, %v798_v39 }
 0x145   :  { %177 = vadd.xlane.f32.xlu0 %v796_v38  ;;  %v183_v40 = vmul.f32 %v796_v38, %v796_v38 }
 0x147   :  { %185 = vadd.xlane.f32.xlu1 %v183_v40 }
 0x149   :  { %179 = vadd.xlane.f32.xlu0 %v798_v39 }
 0x14b   :  { %187 = vadd.xlane.f32.xlu1 %v184_v41 }
 0x1d2   :  { %v178_v63 = vpop.xlane.xlu0 %177 }
 0x1d3   :  { %v181_v0 = vmul.f32 0.03125, %v178_v63 }
 0x1d4   :  { %v186_v1 = vpop.xlane.xlu1 %185 }
 0x1d5   :  { %v191_v2 = vmul.f32 %v181_v0, %v181_v0  ;;  %v189_v3 = vmul.f32 0.03125, %v186_v1  ;;  %v197_v17 = vsub.f32 %v796_v38, %v181_v0 }
 0x1d6   :  { %v180_v4 = vpop.xlane.xlu0 %179 }
 0x1d7   :  { %v193_v5 = vsub.f32 %v189_v3, %v191_v2  ;;  %v182_v6 = vmul.f32 0.03125, %v180_v4 }
 0x1d8   :  { %v188_v7 = vpop.xlane.xlu1 %187 }
 0x1d9   :  { %v195_v8 = vmax.f32 %v193_v5, 0.0  ;;  %v192_v9 = vmul.f32 %v182_v6, %v182_v6  ;;  %v190_v10 = vmul.f32 0.03125, %v188_v7  ;;  %v198_v22 = vsub.f32 %v798_v39, %v182_v6 }
 0x1db   :  { %v199_v11 = vadd.f32 1e-05, %v195_v8  ;;  %v194_v12 = vsub.f32 %v190_v10, %v192_v9 }
 0x1dd   :  { %554 = vrsqrt.f32 %v199_v11  ;;  %v196_v13 = vmax.f32 %v194_v12, 0.0 }
 0x1df   :  { %v200_v14 = vadd.f32 1e-05, %v196_v13 }
 0x1e1   :  { %556 = vrsqrt.f32 %v200_v14 }
 0x1e7   :  { %v555_v19 = vpop.eup %554 }
 0x1e8   :  { %v203_v20 = vmul.f32 %v555_v19, %v197_v17 }
 0x1ea   :  { %v209_v23 = vmul.f32 %v208_v18, %v203_v20 }
 0x1eb   :  { %v557_v24 = vpop.eup %556 }
 0x1ec   :  { %v215_v25 = vadd.f32 %v214_v21, %v209_v23  ;;  %v204_v26 = vmul.f32 %v557_v24, %v198_v22 }
 0x1ee   :  { %480 = vmatprep.mubr.f32.mxu1 %v215_v25  ;;  %v210_v27 = vmul.f32 %v208_v18, %v204_v26 }
 0x1f0   :  { %v216_v28 = vadd.f32 %v214_v21, %v210_v27 }
 0x1f2   :  { %481 = vmatmul.mubr.f32.vlgmr.msra.gmra.mrb[0].mxu1 %v216_v28 }
 0x2c5   :  { %v482_v34 = vpop.f32.mrb[0].mxu1 }
 0x2c6   :  { %v309_v35 = vadd.f32 %v482_v34, %v216_v28  ;;  %v299_v32 = vpop.f32.mrb[1].mxu1 }
 0x2c7   :  { %v308_v36 = vadd.f32 %v299_v32, %v215_v25 }
 0x2c8   :  { %v315_v37 = vadd.f32 %v313_v33, %v309_v35 }
 0x2c9   :  { %v314_v38 = vadd.f32 %v313_v33, %v308_v36 }
 0x2ca   :  { %318 = vadd.xlane.f32.xlu1 %v315_v37  ;;  %v323_v39 = vmul.f32 %v315_v37, %v315_v37 }
 0x2cb   :  { %316 = vadd.xlane.f32.xlu0 %v314_v38  ;;  %v322_v40 = vmul.f32 %v314_v38, %v314_v38 }
 0x2ce   :  { %326 = vadd.xlane.f32.xlu1 %v323_v39 }
 0x2cf   :  { %324 = vadd.xlane.f32.xlu0 %v322_v40 }
 0x357   :  { %v319_v41 = vpop.xlane.xlu1 %318 }
 0x358   :  { %v321_v42 = vmul.f32 0.03125, %v319_v41  ;;  %v317_v43 = vpop.xlane.xlu0 %316 }
 0x359   :  { %v320_v44 = vmul.f32 0.03125, %v317_v43 }
 0x35a   :  { %v331_v46 = vmul.f32 %v321_v42, %v321_v42  ;;  %v337_v56 = vsub.f32 %v315_v37, %v321_v42 }
 0x35b   :  { %v327_v45 = vpop.xlane.xlu1 %326  ;;  %v330_v47 = vmul.f32 %v320_v44, %v320_v44  ;;  %v336_v58 = vsub.f32 %v314_v38, %v320_v44 }
 0x35c   :  { %v329_v30 = vmul.f32 0.03125, %v327_v45  ;;  %v325_v31 = vpop.xlane.xlu0 %324 }
 0x35d   :  { %v328_v48 = vmul.f32 0.03125, %v325_v31 }
 0x35e   :  { %v333_v49 = vsub.f32 %v329_v30, %v331_v46 }
 0x35f   :  { %v332_v50 = vsub.f32 %v328_v48, %v330_v47 }
 0x360   :  { %v335_v51 = vmax.f32 %v333_v49, 0.0 }
 0x361   :  { %v334_v52 = vmax.f32 %v332_v50, 0.0 }
 0x362   :  { %v339_v53 = vadd.f32 1e-05, %v335_v51 }
 0x363   :  { %v338_v54 = vadd.f32 1e-05, %v334_v52 }
 0x364   :  { %558 = vrsqrt.f32 %v339_v53 }
 0x365   :  { %560 = vrsqrt.f32 %v338_v54 }
 0x36e   :  { %v559_v57 = vpop.eup %558 }
 0x36f   :  { %v561_v59 = vpop.eup %560  ;;  %v343_v60 = vmul.f32 %v559_v57, %v337_v56 }
 0x370   :  { %v342_v62 = vmul.f32 %v561_v59, %v336_v58 }
 0x371   :  { %v349_v63 = vmul.f32 %v347_v55, %v343_v60 }
 0x372   :  { %v348_v0 = vmul.f32 %v347_v55, %v342_v62 }
 0x373   :  { %v355_v1 = vadd.f32 %v353_v61, %v349_v63 }
 0x374   :  { %v354_v2 = vadd.f32 %v353_v61, %v348_v0 }
 0x375   :  { %357 = vst [vmem:[#allocation10 + $0x8] sm:$0xff] %v355_v1 }
 0x376   :  { %356 = vst [vmem:[#allocation10] sm:$0xff] %v354_v2 }
 0x377   :  { %661 = shalt.err (!%p658_p8)
}
 0x378   :  { %s662_s22 = scalar_lea.hbm %s837_s5, 256 }
 0x379   :  { %p663_p9 = scmp.ne.s32.totalorder %s837_s5, %s662_s22  ;;  %p666_p10 = scmp.lt.u32.totalorder %s662_s22, %s837_s5 }
 0x37b   :  { %p668_p11 = pnand %p666_p10, %p663_p9 }
 0x37d   :  { %671 = shalt.err (!%p668_p11)
}
 0x37e   :  { %369 = dma.vmem_to_hbm [thread:$0]  %s364_s17, 256, %s837_s5, [#allocation4], %s682_s30, %s682_s30, %s683_s6  }
 0x37f   :  { %678 = dma.done.wait [#allocation4], 256  }
 0x380   :  { %679 = vsyncadd [#allocation4], 4294967040 }
 0x381   :  { %373 = vsyncpa [#allocation3], 1 }
 0x382   :  { %374 = vsyncpa [#allocation6], 1 }
 0x383   :  { %375 = vsyncpa [#allocation9], 1 }
 0x384   :  { %376 = vsyncpa [#allocation4], 1 }

</bundles_post_ra>
